<compile_context>
chip_gen: v7x
topology: tpu7x:2x2x1
jax: 0.10.0
libtpu: 0.0.40
codegen_flags: <defaults>
</compile_context>

<pallas_src>
import jax
import jax.numpy as jnp
from jax.experimental import pallas as pl
from jax.experimental.pallas import tpu as pltpu

IN_DIM = 182
HID = 128
OUT_DIM = 64

_MAX_TILE = 1024  # keeps VMEM use well under v5e's 16 MiB default scoped limit


def _round_up(x, m):
    return (x + m - 1) // m * m


def _choose_batch_tile(B):
    if B <= 256:
        # single grid step, rounded to a whole number of sublanes
        return _round_up(max(B, 1), 8)
    # large B: at least 2 grid steps (v7x has 2 TensorCores on the "parallel" axis),
    # tile <= _MAX_TILE, sized so the ragged final tile wastes as little as possible.
    n_tiles = max(2, pl.cdiv(B, _MAX_TILE))
    return min(_round_up(pl.cdiv(B, n_tiles), 8), _MAX_TILE)


def state_encoder_kernel(x_ref, w1_ref, resw_ref, wl_ref, b_ref, o_ref):
    # Hoist the bias slab once (f32). Rows: [b1, r0a, r0b, r1a, r1b, bl, 0, 0]
    biases = b_ref[...]
    b1 = biases[0:1, :]
    b0a = biases[1:2, :]
    b0b = biases[2:3, :]
    b1a = biases[3:4, :]
    b1b = biases[4:5, :]
    bl = biases[5:6, :OUT_DIM]

    cdt = w1_ref.dtype  # compute dtype of the matmul operands (bf16 by default)

    # fc_1 + ReLU.  x is cast to the operand dtype in-kernel (cheap VALU work) so the
    # HBM side never needs a separate cast/pad pass.  K = 182 (native); Mosaic pads
    # the MXU K dimension internally.
    h = jnp.dot(x_ref[...].astype(cdt), w1_ref[...],
                preferred_element_type=jnp.float32)
    h = jnp.maximum(h + b1, 0.0)

    def res_block(h, wa, ba, wb, bb):
        # Linear -> ReLU -> (Dropout = identity in eval) -> Linear, + identity, ReLU
        t = jnp.dot(h.astype(cdt), wa, preferred_element_type=jnp.float32)
        t = jnp.maximum(t + ba, 0.0)
        t = jnp.dot(t.astype(cdt), wb, preferred_element_type=jnp.float32) + bb
        return jnp.maximum(t + h, 0.0)

    h = res_block(h, resw_ref[0], b0a, resw_ref[1], b0b)
    h = res_block(h, resw_ref[2], b1a, resw_ref[3], b1b)

    # fc_last + ReLU, stored directly at 64 lanes (no output padding / post-slice).
    o = jnp.dot(h.astype(cdt), wl_ref[...], preferred_element_type=jnp.float32)
    o_ref[...] = jnp.maximum(o + bl, 0.0).astype(o_ref.dtype)


def pack_params(params, compute_dtype=jnp.bfloat16):
    """One-time packing: weights cast to the MXU operand dtype, biases into one f32 slab."""
    (w1, b1, r0a_w, r0a_b, r0b_w, r0b_b,
     r1a_w, r1a_b, r1b_w, r1b_b, wl, bl) = params

    res_w = jnp.stack([r0a_w, r0b_w, r1a_w, r1b_w], axis=0)  # (4, HID, HID)

    biases = jnp.zeros((8, HID), jnp.float32)
    biases = biases.at[0, :].set(b1[0])
    biases = biases.at[1, :].set(r0a_b[0])
    biases = biases.at[2, :].set(r0b_b[0])
    biases = biases.at[3, :].set(r1a_b[0])
    biases = biases.at[4, :].set(r1b_b[0])
    biases = biases.at[5, :OUT_DIM].set(bl[0])

    return (w1.astype(compute_dtype),
            res_w.astype(compute_dtype),
            wl.astype(compute_dtype),
            biases)  # biases stay f32 (elementwise math in f32)


def state_encoder(x, packed_params, *, batch_tile=None, out_dtype=jnp.float32):
    w1p, res_w, wlp, biases = packed_params
    B = x.shape[0]
    assert x.shape[1] == IN_DIM

    if batch_tile is None:
        batch_tile = _choose_batch_tile(B)
    n_tiles = pl.cdiv(B, batch_tile)  # ragged final tile; OOB output writes are masked

    in_specs = [
        pl.BlockSpec((batch_tile, IN_DIM), lambda i: (i, 0)),   # x tile (native 182 cols)
        pl.BlockSpec((IN_DIM, HID), lambda i: (0, 0)),          # fc_1 weight (resident)
        pl.BlockSpec((4, HID, HID), lambda i: (0, 0, 0)),       # stacked residual weights
        pl.BlockSpec((HID, OUT_DIM), lambda i: (0, 0)),         # fc_last weight
        pl.BlockSpec((8, HID), lambda i: (0, 0)),               # bias slab (f32)
    ]
    out_spec = pl.BlockSpec((batch_tile, OUT_DIM), lambda i: (i, 0))

    w_itemsize = jnp.dtype(w1p.dtype).itemsize
    flops = 2 * B * HID * (IN_DIM + 4 * HID + OUT_DIM)
    bytes_accessed = (x.size * jnp.dtype(x.dtype).itemsize
                      + (w1p.size + res_w.size + wlp.size) * w_itemsize
                      + biases.size * 4
                      + B * OUT_DIM * jnp.dtype(out_dtype).itemsize)

    return pl.pallas_call(
        state_encoder_kernel,
        out_shape=jax.ShapeDtypeStruct((B, OUT_DIM), out_dtype),
        grid_spec=pltpu.PrefetchScalarGridSpec(
            num_scalar_prefetch=0,
            grid=(n_tiles,),
            in_specs=in_specs,
            out_specs=out_spec,
        ),
        compiler_params=pltpu.CompilerParams(
            dimension_semantics=("parallel",)),
        cost_estimate=pl.CostEstimate(
            flops=flops, transcendentals=0, bytes_accessed=bytes_accessed),
    )(x, w1p, res_w, wlp, biases)


def init_params(key):
    """Deterministic synthetic params. Linear(in, out): W stored (in, out), b stored (1, out)."""
    def linear(k, fan_in, fan_out):
        kw, kb = jax.random.split(k)
        bound = 1.0 / jnp.sqrt(fan_in)
        w = jax.random.uniform(kw, (fan_in, fan_out), jnp.float32, -bound, bound)
        b = jax.random.uniform(kb, (1, fan_out), jnp.float32, -bound, bound)
        return w, b

    keys = jax.random.split(key, 6)
    w1, b1 = linear(keys[0], IN_DIM, HID)
    r0a_w, r0a_b = linear(keys[1], HID, HID)
    r0b_w, r0b_b = linear(keys[2], HID, HID)
    r1a_w, r1a_b = linear(keys[3], HID, HID)
    r1b_w, r1b_b = linear(keys[4], HID, HID)
    wl, bl = linear(keys[5], HID, OUT_DIM)
    return (w1, b1, r0a_w, r0a_b, r0b_w, r0b_b,
            r1a_w, r1a_b, r1b_w, r1b_b, wl, bl)


def reference_forward(x, params, compute_dtype=jnp.float32):
    (w1, b1, r0a_w, r0a_b, r0b_w, r0b_b,
     r1a_w, r1a_b, r1b_w, r1b_b, wl, bl) = params

    def mm(a, w):
        return jnp.dot(a.astype(compute_dtype), w.astype(compute_dtype),
                       preferred_element_type=jnp.float32)

    h = jnp.maximum(mm(x, w1) + b1, 0.0)
    t = jnp.maximum(mm(h, r0a_w) + r0a_b, 0.0)
    h = jnp.maximum(mm(t, r0b_w) + r0b_b + h, 0.0)
    t = jnp.maximum(mm(h, r1a_w) + r1a_b, 0.0)
    h = jnp.maximum(mm(t, r1b_w) + r1b_b + h, 0.0)
    return jnp.maximum(mm(h, wl) + bl, 0.0)


if __name__ == "__main__":
    key = jax.random.PRNGKey(0)
    kx, kp = jax.random.split(key)
    params = init_params(kp)

    # 1) Small batch, f32 operands: strict numerical check vs. the f32 reference.
    B_small = 16
    x_small = jax.random.normal(kx, (B_small, IN_DIM), jnp.float32)
    packed_f32 = pack_params(params, compute_dtype=jnp.float32)
    out_f32 = jax.block_until_ready(state_encoder(x_small, packed_f32))
    ref_f32_small = reference_forward(x_small, params, compute_dtype=jnp.float32)
    assert out_f32.shape == (B_small, OUT_DIM)
    assert jnp.allclose(out_f32, ref_f32_small, atol=1e-4, rtol=1e-4)

    # 2) Larger ragged batch, default bf16 operands: exercises the 2-step "parallel"
    #    grid (v7x megacore) and the masked final tile (300 % 152 != 0).
    B_large = 300
    x_large = jax.random.normal(kx, (B_large, IN_DIM), jnp.float32)
    packed_bf16 = pack_params(params)  # bf16 operands, f32 accumulation
    out_bf16 = jax.block_until_ready(state_encoder(x_large, packed_bf16))
    assert out_bf16.shape == (B_large, OUT_DIM)

    # matched-precision equivalence check ...
    ref_bf16 = reference_forward(x_large, params, compute_dtype=jnp.bfloat16)
    assert jnp.allclose(out_bf16, ref_bf16, atol=2e-2, rtol=2e-2)
    # ... plus a looser sanity bound on bf16 quantization vs. the f32 model.
    ref_f32_large = reference_forward(x_large, params, compute_dtype=jnp.float32)
    assert jnp.allclose(out_bf16, ref_f32_large, atol=1e-1, rtol=1e-1)

    print("KERNEL_OK")
</pallas_src>

<mosaic_0001>
module attributes {stable_mosaic.version = 11 : i64} {
  func.func @state_encoder_kernel(%arg0: i32, %arg1: memref<16x182xf32, #tpu.memory_space<vmem>>, %arg2: memref<182x128xf32, #tpu.memory_space<vmem>>, %arg3: memref<4x128x128xf32, #tpu.memory_space<vmem>>, %arg4: memref<128x64xf32, #tpu.memory_space<vmem>>, %arg5: memref<8x128xf32, #tpu.memory_space<vmem>>, %arg6: memref<16x64xf32, #tpu.memory_space<vmem>>) attributes {dimension_semantics = [#tpu.dimension_semantics<parallel>], iteration_bounds = array<i64: 1>, scalar_prefetch = 0 : i64, scratch_operands = 0 : i64, tpu.core_type = #tpu.core_type<tc>, window_params = [{transform_indices = @transform_0, window_bounds = array<i64: 16, 182>}, {pipeline_mode = #tpu.pipeline_mode<synchronous>, transform_indices = @transform_1, window_bounds = array<i64: 182, 128>}, {pipeline_mode = #tpu.pipeline_mode<synchronous>, transform_indices = @transform_2, window_bounds = array<i64: 4, 128, 128>}, {pipeline_mode = #tpu.pipeline_mode<synchronous>, transform_indices = @transform_3, window_bounds = array<i64: 128, 64>}, {pipeline_mode = #tpu.pipeline_mode<synchronous>, transform_indices = @transform_4, window_bounds = array<i64: 8, 128>}, {transform_indices = @transform_5, window_bounds = array<i64: 16, 64>}]} {
    %c0 = arith.constant 0 : index
    %c0_0 = arith.constant 0 : index
    %0 = vector.load %arg5[%c0, %c0_0] : memref<8x128xf32, #tpu.memory_space<vmem>>, vector<8x128xf32>
    %1 = vector.extract_strided_slice %0 {offsets = [0, 0], sizes = [1, 128], strides = [1, 1]} : vector<8x128xf32> to vector<1x128xf32>
    %2 = vector.extract_strided_slice %0 {offsets = [1, 0], sizes = [1, 128], strides = [1, 1]} : vector<8x128xf32> to vector<1x128xf32>
    %3 = vector.extract_strided_slice %0 {offsets = [2, 0], sizes = [1, 128], strides = [1, 1]} : vector<8x128xf32> to vector<1x128xf32>
    %4 = vector.extract_strided_slice %0 {offsets = [3, 0], sizes = [1, 128], strides = [1, 1]} : vector<8x128xf32> to vector<1x128xf32>
    %5 = vector.extract_strided_slice %0 {offsets = [4, 0], sizes = [1, 128], strides = [1, 1]} : vector<8x128xf32> to vector<1x128xf32>
    %6 = vector.extract_strided_slice %0 {offsets = [5, 0], sizes = [1, 64], strides = [1, 1]} : vector<8x128xf32> to vector<1x64xf32>
    %c0_1 = arith.constant 0 : index
    %c0_2 = arith.constant 0 : index
    %7 = vector.load %arg1[%c0_1, %c0_2] : memref<16x182xf32, #tpu.memory_space<vmem>>, vector<16x182xf32>
    %c0_3 = arith.constant 0 : index
    %c0_4 = arith.constant 0 : index
    %8 = vector.load %arg2[%c0_3, %c0_4] : memref<182x128xf32, #tpu.memory_space<vmem>>, vector<182x128xf32>
    %cst = arith.constant dense<0.000000e+00> : vector<16x128xf32>
    %9 = tpu.matmul %7, %8, %cst {dimension_numbers = #tpu.dot_dimension_numbers<[1], [0], [0], [1], [0, 0, 1, 1], [], []>} : vector<16x182xf32>, vector<182x128xf32>, vector<16x128xf32> -> vector<16x128xf32>
    %10 = vector.broadcast %1 : vector<1x128xf32> to vector<16x128xf32>
    %11 = arith.addf %9, %10 : vector<16x128xf32>
    %cst_5 = arith.constant 0.000000e+00 : f32
    %12 = vector.broadcast %cst_5 : f32 to vector<16x128xf32>
    %13 = arith.maximumf %11, %12 : vector<16x128xf32>
    %c0_6 = arith.constant 0 : index
    %c0_7 = arith.constant 0 : index
    %c0_8 = arith.constant 0 : index
    %14 = vector.load %arg3[%c0_6, %c0_7, %c0_8] : memref<4x128x128xf32, #tpu.memory_space<vmem>>, vector<1x128x128xf32>
    %15 = vector.shape_cast %14 : vector<1x128x128xf32> to vector<128x128xf32>
    %c1 = arith.constant 1 : index
    %c0_9 = arith.constant 0 : index
    %c0_10 = arith.constant 0 : index
    %16 = vector.load %arg3[%c1, %c0_9, %c0_10] : memref<4x128x128xf32, #tpu.memory_space<vmem>>, vector<1x128x128xf32>
    %17 = vector.shape_cast %16 : vector<1x128x128xf32> to vector<128x128xf32>
    %cst_11 = arith.constant dense<0.000000e+00> : vector<16x128xf32>
    %18 = tpu.matmul %13, %15, %cst_11 {dimension_numbers = #tpu.dot_dimension_numbers<[1], [0], [0], [1], [0, 0, 1, 1], [], []>} : vector<16x128xf32>, vector<128x128xf32>, vector<16x128xf32> -> vector<16x128xf32>
    %19 = vector.broadcast %2 : vector<1x128xf32> to vector<16x128xf32>
    %20 = arith.addf %18, %19 : vector<16x128xf32>
    %cst_12 = arith.constant 0.000000e+00 : f32
    %21 = vector.broadcast %cst_12 : f32 to vector<16x128xf32>
    %22 = arith.maximumf %20, %21 : vector<16x128xf32>
    %cst_13 = arith.constant dense<0.000000e+00> : vector<16x128xf32>
    %23 = tpu.matmul %22, %17, %cst_13 {dimension_numbers = #tpu.dot_dimension_numbers<[1], [0], [0], [1], [0, 0, 1, 1], [], []>} : vector<16x128xf32>, vector<128x128xf32>, vector<16x128xf32> -> vector<16x128xf32>
    %24 = vector.broadcast %3 : vector<1x128xf32> to vector<16x128xf32>
    %25 = arith.addf %23, %24 : vector<16x128xf32>
    %26 = arith.addf %25, %13 : vector<16x128xf32>
    %cst_14 = arith.constant 0.000000e+00 : f32
    %27 = vector.broadcast %cst_14 : f32 to vector<16x128xf32>
    %28 = arith.maximumf %26, %27 : vector<16x128xf32>
    %c2 = arith.constant 2 : index
    %c0_15 = arith.constant 0 : index
    %c0_16 = arith.constant 0 : index
    %29 = vector.load %arg3[%c2, %c0_15, %c0_16] : memref<4x128x128xf32, #tpu.memory_space<vmem>>, vector<1x128x128xf32>
    %30 = vector.shape_cast %29 : vector<1x128x128xf32> to vector<128x128xf32>
    %c3 = arith.constant 3 : index
    %c0_17 = arith.constant 0 : index
    %c0_18 = arith.constant 0 : index
    %31 = vector.load %arg3[%c3, %c0_17, %c0_18] : memref<4x128x128xf32, #tpu.memory_space<vmem>>, vector<1x128x128xf32>
    %32 = vector.shape_cast %31 : vector<1x128x128xf32> to vector<128x128xf32>
    %cst_19 = arith.constant dense<0.000000e+00> : vector<16x128xf32>
    %33 = tpu.matmul %28, %30, %cst_19 {dimension_numbers = #tpu.dot_dimension_numbers<[1], [0], [0], [1], [0, 0, 1, 1], [], []>} : vector<16x128xf32>, vector<128x128xf32>, vector<16x128xf32> -> vector<16x128xf32>
    %34 = vector.broadcast %4 : vector<1x128xf32> to vector<16x128xf32>
    %35 = arith.addf %33, %34 : vector<16x128xf32>
    %cst_20 = arith.constant 0.000000e+00 : f32
    %36 = vector.broadcast %cst_20 : f32 to vector<16x128xf32>
    %37 = arith.maximumf %35, %36 : vector<16x128xf32>
    %cst_21 = arith.constant dense<0.000000e+00> : vector<16x128xf32>
    %38 = tpu.matmul %37, %32, %cst_21 {dimension_numbers = #tpu.dot_dimension_numbers<[1], [0], [0], [1], [0, 0, 1, 1], [], []>} : vector<16x128xf32>, vector<128x128xf32>, vector<16x128xf32> -> vector<16x128xf32>
    %39 = vector.broadcast %5 : vector<1x128xf32> to vector<16x128xf32>
    %40 = arith.addf %38, %39 : vector<16x128xf32>
    %41 = arith.addf %40, %28 : vector<16x128xf32>
    %cst_22 = arith.constant 0.000000e+00 : f32
    %42 = vector.broadcast %cst_22 : f32 to vector<16x128xf32>
    %43 = arith.maximumf %41, %42 : vector<16x128xf32>
    %c0_23 = arith.constant 0 : index
    %c0_24 = arith.constant 0 : index
    %44 = vector.load %arg4[%c0_23, %c0_24] : memref<128x64xf32, #tpu.memory_space<vmem>>, vector<128x64xf32>
    %cst_25 = arith.constant dense<0.000000e+00> : vector<16x64xf32>
    %45 = tpu.matmul %43, %44, %cst_25 {dimension_numbers = #tpu.dot_dimension_numbers<[1], [0], [0], [1], [0, 0, 1, 1], [], []>} : vector<16x128xf32>, vector<128x64xf32>, vector<16x64xf32> -> vector<16x64xf32>
    %46 = vector.broadcast %6 : vector<1x64xf32> to vector<16x64xf32>
    %47 = arith.addf %45, %46 : vector<16x64xf32>
    %cst_26 = arith.constant 0.000000e+00 : f32
    %48 = vector.broadcast %cst_26 : f32 to vector<16x64xf32>
    %49 = arith.maximumf %47, %48 : vector<16x64xf32>
    %c0_27 = arith.constant 0 : index
    %c0_28 = arith.constant 0 : index
    %50 = vector.load %arg6[%c0_27, %c0_28] : memref<16x64xf32, #tpu.memory_space<vmem>>, vector<16x64xf32>
    tpu.vector_store %arg6[%c0_27, %c0_28], %49 {strides = array<i32>} : memref<16x64xf32, #tpu.memory_space<vmem>>, vector<16x64xf32>,
    return
  }
  func.func @transform_0(%arg0: i32) -> (i32, i32) {
    %c0_i32 = arith.constant 0 : i32
    %c0_i32_0 = arith.constant 0 : i32
    return %arg0, %c0_i32 : i32, i32
  }
  func.func @transform_1(%arg0: i32) -> (i32, i32) {
    %c0_i32 = arith.constant 0 : i32
    %c0_i32_0 = arith.constant 0 : i32
    %c0_i32_1 = arith.constant 0 : i32
    return %c0_i32, %c0_i32_0 : i32, i32
  }
  func.func @transform_2(%arg0: i32) -> (i32, i32, i32) {
    %c0_i32 = arith.constant 0 : i32
    %c0_i32_0 = arith.constant 0 : i32
    %c0_i32_1 = arith.constant 0 : i32
    %c0_i32_2 = arith.constant 0 : i32
    return %c0_i32, %c0_i32_0, %c0_i32_1 : i32, i32, i32
  }
  func.func @transform_3(%arg0: i32) -> (i32, i32) {
    %c0_i32 = arith.constant 0 : i32
    %c0_i32_0 = arith.constant 0 : i32
    %c0_i32_1 = arith.constant 0 : i32
    return %c0_i32, %c0_i32_0 : i32, i32
  }
  func.func @transform_4(%arg0: i32) -> (i32, i32) {
    %c0_i32 = arith.constant 0 : i32
    %c0_i32_0 = arith.constant 0 : i32
    %c0_i32_1 = arith.constant 0 : i32
    return %c0_i32, %c0_i32_0 : i32, i32
  }
  func.func @transform_5(%arg0: i32) -> (i32, i32) {
    %c0_i32 = arith.constant 0 : i32
    %c0_i32_0 = arith.constant 0 : i32
    return %arg0, %c0_i32 : i32, i32
  }
}

</mosaic_0001>

<bundles_post_ra>
// kernel: tpu_custom_call.1
= control target key start
LH: loop header
LB: loop body
LE: loop exit
PB: predicated region body
PF: predicated region fallthrough
CT: control target
= control target key end

     0   :  { %10 = vsyncpa [#allocation3], 0  ;;  %s1482_s0 = inlined_call_operand.hbm [shape: f32[16,182], index: 0, kind: input, shape index: {}]   ;;  %s1483_s1 = inlined_call_operand.vmem [shape: f32[182,128], index: 1, kind: input, shape index: {}]   ;;  %s1484_s2 = inlined_call_operand.hbm [shape: f32[4,128,128], index: 2, kind: input, shape index: {}]   ;;  %s1485_s3 = inlined_call_operand.vmem [shape: f32[128,64], index: 3, kind: input, shape index: {}]   ;;  %s1486_s4 = inlined_call_operand.vmem [shape: f32[8,128], index: 4, kind: input, shape index: {}]   ;;  %s1487_s5 = inlined_call_operand.hbm [shape: f32[16,64], index: 5, kind: output, shape index: {}]  }
   0x1   :  { %11 = vsyncpa [#allocation6], 0 }
   0x2   :  { %12 = vsyncpa [#allocation4], 0  ;;  %s1224_s18 = smov [#allocation2]   ;;  %s1152_s22 = scalar_lea.hbm %s1482_s0, 512 }
   0x3   :  { %s18_s19 = sshll.u32 %s1224_s18, 4  ;;  %p1153_p0 = scmp.ne.s32.totalorder %s1482_s0, %s1152_s22  ;;  %s19_s19 = int_to_ptr.vmem [resolvable:$true] %s18_s19 }
   0x4   :  { %p1156_p1 = scmp.lt.u32.totalorder %s1152_s22, %s1482_s0 }
   0x6   :  { %p1158_p2 = pnand %p1156_p1, %p1153_p0 }
   0x8   :  { %1161 = shalt.err (!%p1158_p2)
}
   0x9   :  { %s1162_s27 = scalar_lea.vmem %s19_s19, 512  ;;  %p1167_p4 = scmp.lt.s32.totalorder %s19_s19, %s19_s19 }
   0xa   :  { %p1163_p3 = scmp.ne.s32.totalorder %s19_s19, %s1162_s27  ;;  %p1168_p5 = scmp.lt.s32.totalorder %s1162_s27, %s1162_s27 }
   0xc   :  { %p1169_p6 = por %p1168_p5, %p1167_p4 }
   0xe   :  { %p1170_p7 = pnand %p1169_p6, %p1163_p3 }
  0x10   :  { %1173 = shalt.err (!%p1170_p7)
}
  0x11   :  { %s1225_s28 = smov 256   ;;  %s1226_s29 = smov 16  }
  0x12   :  { %24 = dma.hbm_to_vmem [thread:$0]  %s1482_s0, 512, %s19_s19, [#allocation3], %s1225_s28, %s1225_s28, %s1226_s29  }
  0x13   :  { %s1227_s7 = smov [#allocation5]   ;;  %s1174_s11 = scalar_lea.hbm %s1484_s2, 8192 }
  0x14   :  { %s32_s8 = sshll.u32 %s1227_s7, 4  ;;  %p1175_p8 = scmp.ne.s32.totalorder %s1484_s2, %s1174_s11  ;;  %s33_s8 = int_to_ptr.vmem [resolvable:$true] %s32_s8 }
  0x15   :  { %p1178_p9 = scmp.lt.u32.totalorder %s1174_s11, %s1484_s2 }
  0x17   :  { %p1180_p10 = pnand %p1178_p9, %p1175_p8 }
  0x19   :  { %1183 = shalt.err (!%p1180_p10)
}
  0x1a   :  { %s1184_s16 = scalar_lea.vmem %s33_s8, 8192  ;;  %p1189_p12 = scmp.lt.s32.totalorder %s33_s8, %s33_s8 }
  0x1b   :  { %p1185_p11 = scmp.ne.s32.totalorder %s33_s8, %s1184_s16  ;;  %p1190_p13 = scmp.lt.s32.totalorder %s1184_s16, %s1184_s16 }
  0x1d   :  { %p1191_p0 = por %p1190_p13, %p1189_p12 }
  0x1f   :  { %p1192_p1 = pnand %p1191_p0, %p1185_p11 }
  0x21   :  { %1195 = shalt.err (!%p1192_p1)
}
  0x22   :  { %s1228_s0 = smov 128   ;;  %s1229_s17 = smov 8  }
  0x23   :  { %38 = dma.hbm_to_vmem [thread:$0]  %s1484_s2, 8192, %s33_s8, [#allocation6], %s1228_s0, %s1228_s0, %s1229_s17  }
  0x24   :  { %1218 = dma.done.wait [#allocation3], 512  }
  0x25   :  { %1219 = vsyncadd [#allocation3], 4294966784 }
  0x26   :  { %1220 = dma.done.wait [#allocation6], 8192  }
  0x27   :  { %1221 = vsyncadd [#allocation6], 4294959104  ;;  %v1230_v0 = vmov 0.0|0.0   ;;  %v54_v1 = vld [vmem:[%s1483_s1] sm:$0xff]  ;;  %v55_v2 = vld [vmem:[%s1483_s1 + $0x8] sm:$0xff]  ;;  %vm81_vm0 = vcmask 441344  }
  0x28   :  { %950 = vmatprep.subr.bf16.mxu0 %v1230_v0  ;;  %v56_v3 = vld [vmem:[%s1483_s1 + $0x10] sm:$0xff]  ;;  %v951_v4 = vpack.c.bf16 %v55_v2, %v54_v1  ;;  %v57_v5 = vld [vmem:[%s1483_s1 + $0x18] sm:$0xff]  ;;  %v58_v7 = vld [vmem:[%s1483_s1 + $0x20] sm:$0xff]  ;;  %v1231_v53 = vmov 0.0   ;;  %vm88_vm1 = vcmask 1045504   ;;  %vm661_vm2 = vcmask 523264  }
  0x29   :  { %v954_v6 = vpack.c.bf16 %v57_v5, %v56_v3  ;;  %v59_v8 = vld [vmem:[%s1483_s1 + $0x28] sm:$0xff]  ;;  %v60_v11 = vld [vmem:[%s1483_s1 + $0x30] sm:$0xff]  ;;  %v61_v12 = vld [vmem:[%s1483_s1 + $0x38] sm:$0xff]  ;;  %v77_v3 = vlaneseq }
  0x2a   :  { %952 = vmatpush1.bf16.msra.mxu0 %v951_v4  ;;  %v957_v9 = vpack.c.bf16 %v59_v8, %v58_v7  ;;  %v51_v10 = vld [vmem:[#allocation2 + $0x8] sm:$0xff]  ;;  %v169_v13 = vld [vmem:[#allocation5] sm:$0xff]  ;;  %v171_v15 = vld [vmem:[#allocation5 + $0x10] sm:$0xff]  ;;  %v960_v18 = vpack.c.bf16 %v61_v12, %v60_v11 }
  0x2b   :  { %953 = vmatprep.subr.bf16.mxu0 %v1230_v0  ;;  %683 = vmatprep.mubr.msk.f32.mxu0 %vm81_vm0, %v51_v10  ;;  %v170_v14 = vld [vmem:[#allocation5 + $0x8] sm:$0xff]  ;;  %v172_v17 = vld [vmem:[#allocation5 + $0x18] sm:$0xff]  ;;  %v173_v20 = vld [vmem:[#allocation5 + $0x20] sm:$0xff]  ;;  %v1372_v4 = vshrl.u32 %v77_v3, 7 }
  0x2c   :  { %v983_v16 = vpack.c.bf16 %v170_v14, %v169_v13  ;;  %v987_v19 = vpack.c.bf16 %v172_v17, %v171_v15  ;;  %v174_v21 = vld [vmem:[#allocation5 + $0x28] sm:$0xff]  ;;  %v62_v22 = vld [vmem:[%s1483_s1 + $0x40] sm:$0xff]  ;;  %v175_v26 = vld [vmem:[#allocation5 + $0x30] sm:$0xff] }
  0x2d   :  { %v63_v23 = vld [vmem:[%s1483_s1 + $0x48] sm:$0xff]  ;;  %v991_v24 = vpack.c.bf16 %v174_v21, %v173_v20  ;;  %v176_v27 = vld [vmem:[#allocation5 + $0x38] sm:$0xff]  ;;  %v64_v28 = vld [vmem:[%s1483_s1 + $0x50] sm:$0xff]  ;;  %v79_v5 = vsub.s32 0, %v1372_v4 }
  0x2e   :  { %955 = vmatpush1.bf16.msra.mxu0 %v954_v6  ;;  %984 = vmatprep.subr.bf16.mxu1 %v983_v16  ;;  %v963_v25 = vpack.c.bf16 %v63_v23, %v62_v22  ;;  %v65_v29 = vld [vmem:[%s1483_s1 + $0x58] sm:$0xff]  ;;  %v995_v30 = vpack.c.bf16 %v176_v27, %v175_v26  ;;  %v177_v32 = vld [vmem:[#allocation5 + $0x40] sm:$0xff]  ;;  %v178_v33 = vld [vmem:[#allocation5 + $0x48] sm:$0xff] }
  0x2f   :  { %956 = vmatprep.subr.bf16.mxu0 %v1230_v0  ;;  %986 = vmatpush3.bf16.msra.mxu1 %v983_v16  ;;  %v966_v31 = vpack.c.bf16 %v65_v29, %v64_v28  ;;  %v66_v34 = vld [vmem:[%s1483_s1 + $0x60] sm:$0xff]  ;;  %v67_v35 = vld [vmem:[%s1483_s1 + $0x68] sm:$0xff]  ;;  %v999_v36 = vpack.c.bf16 %v178_v33, %v177_v32  ;;  %v179_v38 = vld [vmem:[#allocation5 + $0x50] sm:$0xff] }
  0x30   :  { %988 = vmatprep.subr.bf16.mxu1 %v987_v19  ;;  %v969_v37 = vpack.c.bf16 %v67_v35, %v66_v34  ;;  %v180_v39 = vld [vmem:[#allocation5 + $0x58] sm:$0xff]  ;;  %v68_v40 = vld [vmem:[%s1483_s1 + $0x70] sm:$0xff]  ;;  %v70_v44 = vld [vmem:[%s1483_s1 + $0x80] sm:$0xff] }
  0x31   :  { %v69_v41 = vld [vmem:[%s1483_s1 + $0x78] sm:$0xff]  ;;  %v1003_v42 = vpack.c.bf16 %v180_v39, %v179_v38  ;;  %v71_v45 = vld [vmem:[%s1483_s1 + $0x88] sm:$0xff]  ;;  %v72_v47 = vld [vmem:[%s1483_s1 + $0x90] sm:$0xff] }
  0x32   :  { %958 = vmatpush1.bf16.msra.mxu0 %v957_v9  ;;  %v972_v43 = vpack.c.bf16 %v69_v41, %v68_v40  ;;  %v975_v46 = vpack.c.bf16 %v71_v45, %v70_v44  ;;  %v73_v48 = vld [vmem:[%s1483_s1 + $0x98] sm:$0xff]  ;;  %v74_v50 = vld [vmem:[%s1483_s1 + $0xa0] sm:$0xff]  ;;  %v75_v51 = vld [vmem:[%s1483_s1 + $0xa8] sm:$0xff] }
  0x33   :  { %959 = vmatprep.subr.bf16.mxu0 %v1230_v0  ;;  %990 = vmatpush3.bf16.msra.mxu1 %v987_v19  ;;  %v978_v49 = vpack.c.bf16 %v73_v48, %v72_v47  ;;  %v981_v52 = vpack.c.bf16 %v75_v51, %v74_v50  ;;  %v76_v54 = vld [vmem:[%s1483_s1 + $0xb0] sm:$0x3f]  ;;  %v50_v55 = vld [vmem:[#allocation2] sm:$0xff]  ;;  %v53_v56 = vld [vmem:[#allocation2 + $0x18] sm:$0xff] }
  0x34   :  { %992 = vmatprep.subr.bf16.mxu1 %v991_v24  ;;  %v52_v57 = vld [vmem:[#allocation2 + $0x10] sm:$0xff]  ;;  %v181_v58 = vld [vmem:[#allocation5 + $0x60] sm:$0xff]  ;;  %v182_v59 = vld [vmem:[#allocation5 + $0x68] sm:$0xff] }
  0x35   :  { %v1007_v60 = vpack.c.bf16 %v182_v59, %v181_v58  ;;  %v183_v61 = vld [vmem:[#allocation5 + $0x70] sm:$0xff]  ;;  %v184_v62 = vld [vmem:[#allocation5 + $0x78] sm:$0xff]  ;;  %v187_v1 = vld [vmem:[#allocation5 + $0x88] sm:$0xff] }
  0x36   :  { %961 = vmatpush1.bf16.msra.mxu0 %v960_v18  ;;  %v1011_v63 = vpack.c.bf16 %v184_v62, %v183_v61  ;;  %v1378_v6 = vld [vmem:[%s1486_s4] sm:$0xff]  ;;  %v188_v13 = vld [vmem:[#allocation5 + $0x90] sm:$0xff]  ;;  %v189_v14 = vld [vmem:[#allocation5 + $0x98] sm:$0xff] }
  0x37   :  { %962 = vmatprep.subr.bf16.mxu0 %v1230_v0  ;;  %994 = vmatpush3.bf16.msra.mxu1 %v991_v24  ;;  %v80_v7 = vrot.slane %v1378_v6, %v79_v5  ;;  %v1019_v18 = vpack.c.bf16 %v189_v14, %v188_v13  ;;  %v190_v19 = vld [vmem:[#allocation5 + $0xa0] sm:$0xff]  ;;  %v191_v20 = vld [vmem:[#allocation5 + $0xa8] sm:$0xff]  ;;  %v192_v22 = vld [vmem:[#allocation5 + $0xb0] sm:$0xff] }
  0x38   :  { %996 = vmatprep.subr.bf16.mxu1 %v995_v30  ;;  %v1023_v21 = vpack.c.bf16 %v191_v20, %v190_v19  ;;  %v193_v23 = vld [vmem:[#allocation5 + $0xb8] sm:$0xff]  ;;  %v195_v26 = vld [vmem:[#allocation5 + $0xc8] sm:$0xff]  ;;  %v196_v28 = vld [vmem:[#allocation5 + $0xd0] sm:$0xff] }
  0x39   :  { %v1027_v24 = vpack.c.bf16 %v193_v23, %v192_v22  ;;  %v197_v29 = vld [vmem:[#allocation5 + $0xd8] sm:$0xff]  ;;  %v199_v32 = vld [vmem:[#allocation5 + $0xe8] sm:$0xff]  ;;  %v200_v34 = vld [vmem:[#allocation5 + $0xf0] sm:$0xff] }
  0x3a   :  { %964 = vmatpush1.bf16.msra.mxu0 %v963_v25  ;;  %v194_v25 = vld [vmem:[#allocation5 + $0xc0] sm:$0xff]  ;;  %v201_v35 = vld [vmem:[#allocation5 + $0xf8] sm:$0xff]  ;;  %v368_v38 = vld [vmem:[#allocation5 + $0x108] sm:$0xff] }
  0x3b   :  { %965 = vmatprep.subr.bf16.mxu0 %v1230_v0  ;;  %998 = vmatpush3.bf16.msra.mxu1 %v995_v30  ;;  %v1031_v27 = vpack.c.bf16 %v195_v26, %v194_v25  ;;  %v1035_v30 = vpack.c.bf16 %v197_v29, %v196_v28  ;;  %v369_v39 = vld [vmem:[#allocation5 + $0x110] sm:$0xff]  ;;  %v370_v41 = vld [vmem:[#allocation5 + $0x118] sm:$0xff]  ;;  %v372_v44 = vld [vmem:[#allocation5 + $0x128] sm:$0xff] }
  0x3c   :  { %1000 = vmatprep.subr.bf16.mxu1 %v999_v36  ;;  %v374_v47 = vld [vmem:[#allocation5 + $0x138] sm:$0xff]  ;;  %v376_v50 = vld [vmem:[#allocation5 + $0x148] sm:$0xff]  ;;  %v390_v20 = vld [vmem:[#allocation5 + $0x1b0] sm:$0xff] }
  0x3d   :  { %v382_v3 = vld [vmem:[#allocation5 + $0x178] sm:$0xff]  ;;  %v392_v23 = vld [vmem:[#allocation5 + $0x1c0] sm:$0xff]  ;;  %v394_v26 = vld [vmem:[#allocation5 + $0x1d0] sm:$0xff] }
  0x3e   :  { %967 = vmatpush1.bf16.msra.mxu0 %v966_v31  ;;  %v198_v31 = vld [vmem:[#allocation5 + $0xe0] sm:$0xff]  ;;  %v387_v13 = vld [vmem:[#allocation5 + $0x198] sm:$0xff] }
  0x3f   :  { %968 = vmatprep.subr.bf16.mxu0 %v1230_v0  ;;  %1002 = vmatpush3.bf16.msra.mxu1 %v999_v36  ;;  %v1039_v33 = vpack.c.bf16 %v199_v32, %v198_v31  ;;  %v1043_v36 = vpack.c.bf16 %v201_v35, %v200_v34  ;;  %v396_v29 = vld [vmem:[#allocation5 + $0x1e0] sm:$0xff]  ;;  %v285_v32 = vsub.s32 2, %v1372_v4 }
  0x40   :  { %1004 = vmatprep.subr.bf16.mxu1 %v1003_v42 }
  0x42   :  { %970 = vmatpush1.bf16.msra.mxu0 %v969_v37  ;;  %v367_v37 = vld [vmem:[#allocation5 + $0x100] sm:$0xff] }
  0x43   :  { %971 = vmatprep.subr.bf16.mxu0 %v1230_v0  ;;  %1006 = vmatpush3.bf16.msra.mxu1 %v1003_v42  ;;  %v1047_v40 = vpack.c.bf16 %v368_v38, %v367_v37  ;;  %v1051_v42 = vpack.c.bf16 %v370_v41, %v369_v39 }
  0x44   :  { %1008 = vmatprep.subr.bf16.mxu1 %v1007_v60 }
  0x46   :  { %973 = vmatpush1.bf16.msra.mxu0 %v972_v43  ;;  %v371_v43 = vld [vmem:[#allocation5 + $0x120] sm:$0xff] }
  0x47   :  { %974 = vmatprep.subr.bf16.mxu0 %v1230_v0  ;;  %1010 = vmatpush3.bf16.msra.mxu1 %v1007_v60  ;;  %v1055_v45 = vpack.c.bf16 %v372_v44, %v371_v43  ;;  %v399_v43 = vld [vmem:[#allocation5 + $0x1f8] sm:$0xff] }
  0x48   :  { %1012 = vmatprep.subr.bf16.mxu1 %v1011_v63 }
  0x4a   :  { %976 = vmatpush1.bf16.msra.mxu0 %v975_v46  ;;  %v373_v46 = vld [vmem:[#allocation5 + $0x130] sm:$0xff] }
  0x4b   :  { %977 = vmatprep.subr.bf16.mxu0 %v1230_v0  ;;  %1014 = vmatpush3.bf16.msra.mxu1 %v1011_v63  ;;  %v1059_v48 = vpack.c.bf16 %v374_v47, %v373_v46  ;;  %v379_v63 = vld [vmem:[#allocation5 + $0x160] sm:$0xff] }
  0x4c   :  { %v568_v47 = vld [vmem:[%s1485_s3 + $0x20] sm:$0xff] }
  0x4e   :  { %979 = vmatpush1.bf16.msra.mxu0 %v978_v49  ;;  %v375_v49 = vld [vmem:[#allocation5 + $0x140] sm:$0xff] }
  0x4f   :  { %980 = vmatprep.subr.bf16.mxu0 %v1230_v0  ;;  %v186_v0 = vld [vmem:[#allocation5 + $0x80] sm:$0xff]  ;;  %v1063_v51 = vpack.c.bf16 %v376_v50, %v375_v49  ;;  %v570_v50 = vld [vmem:[%s1485_s3 + $0x30] sm:$0xff] }
  0x50   :  { %v1015_v2 = vpack.c.bf16 %v187_v1, %v186_v0  ;;  %v380_v0 = vld [vmem:[#allocation5 + $0x168] sm:$0xff] }
  0x51   :  { %v1071_v1 = vpack.c.bf16 %v380_v0, %v379_v63 }
  0x52   :  { %982 = vmatpush1.bf16.msra.mxu0 %v981_v52  ;;  %1016 = vmatprep.subr.bf16.mxu1 %v1015_v2  ;;  %v377_v52 = vld [vmem:[#allocation5 + $0x150] sm:$0xff] }
  0x53   :  { %136 = vmatprep.subr.mxu0 %v1231_v53  ;;  %v378_v53 = vld [vmem:[#allocation5 + $0x158] sm:$0xff] }
  0x56   :  { %682 = vmatpush1.msk.msra.mxu0 %vm88_vm1, %v76_v54  ;;  %v1067_v54 = vpack.c.bf16 %v378_v53, %v377_v52  ;;  %v572_v53 = vld [vmem:[%s1485_s3 + $0x40] sm:$0xff] }
  0x57   :  { %157 = vmatmul.mubr.f32.vlgmr.msra.gmra.mrb[0].mxu0 %v50_v55  ;;  %1048 = vmatprep.subr.bf16.mxu0 %v1047_v40  ;;  %v204_v55 = vsub.s32 1, %v1372_v4 }
  0x58   :  { %684 = vmatprep.mubr.msk.f32.mxu0 %vm81_vm0, %v53_v56  ;;  %1050 = vmatpush3.bf16.msra.mxu0 %v1047_v40 }
  0x59   :  { %1052 = vmatprep.subr.bf16.mxu0 %v1051_v42  ;;  %v205_v56 = vrot.slane %v1378_v6, %v204_v55 }
  0x5b   :  { %162 = vmatmul.mubr.f32.gmra.mrb[2].mxu0 %v52_v57 }
  0x5c   :  { %1054 = vmatpush3.bf16.msra.mxu0 %v1051_v42  ;;  %v398_v42 = vld [vmem:[#allocation5 + $0x1f0] sm:$0xff] }
  0x5d   :  { %1056 = vmatprep.subr.bf16.mxu0 %v1055_v45  ;;  %v1107_v44 = vpack.c.bf16 %v399_v43, %v398_v42 }
  0x60   :  { %1058 = vmatpush3.bf16.msra.mxu0 %v1055_v45  ;;  %v567_v45 = vld [vmem:[%s1485_s3 + $0x18] sm:$0xff] }
  0x61   :  { %1060 = vmatprep.subr.bf16.mxu0 %v1059_v48 }
  0x64   :  { %1062 = vmatpush3.bf16.msra.mxu0 %v1059_v48  ;;  %v569_v48 = vld [vmem:[%s1485_s3 + $0x28] sm:$0xff] }
  0x65   :  { %1064 = vmatprep.subr.bf16.mxu0 %v1063_v51  ;;  %v1119_v49 = vpack.c.bf16 %v569_v48, %v568_v47 }
  0x68   :  { %1066 = vmatpush3.bf16.msra.mxu0 %v1063_v51  ;;  %v571_v51 = vld [vmem:[%s1485_s3 + $0x38] sm:$0xff] }
  0x69   :  { %1068 = vmatprep.subr.bf16.mxu0 %v1067_v54  ;;  %v1123_v52 = vpack.c.bf16 %v571_v51, %v570_v50 }
  0x6c   :  { %1070 = vmatpush3.bf16.msra.mxu0 %v1067_v54  ;;  %v573_v54 = vld [vmem:[%s1485_s3 + $0x48] sm:$0xff] }
  0x6d   :  { %1072 = vmatprep.subr.bf16.mxu0 %v1071_v1  ;;  %v1127_v55 = vpack.c.bf16 %v573_v54, %v572_v53 }
  0x70   :  { %1074 = vmatpush3.bf16.msra.mxu0 %v1071_v1 }
 0x12a   :  { %v158_v8 = vpop.f32.mrb[0].mxu0 }
 0x12b   :  { %v1381_v9 = vadd.f32 %v158_v8, %v80_v7  ;;  %v160_v10 = vpop.f32.mrb[1].mxu0  ;;  %v385_v8 = vld [vmem:[#allocation5 + $0x188] sm:$0xff] }
 0x12c   :  { %v386_v10 = vld [vmem:[#allocation5 + $0x190] sm:$0xff] }
 0x12d   :  { %v167_v11 = vmax.f32 %v1381_v9, 0.0  ;;  %v1083_v14 = vpack.c.bf16 %v387_v13, %v386_v10  ;;  %v564_v9 = vld [vmem:[%s1485_s3] sm:$0xff]  ;;  %v579_v10 = vld [vmem:[%s1485_s3 + $0x78] sm:$0xff]  ;;  %v483_v13 = vsub.s32 4, %v1372_v4 }
 0x12e   :  { %v163_v12 = vpop.f32.mrb[2].mxu0 }
 0x12f   :  { %v1384_v15 = vadd.f32 %v163_v12, %v80_v7  ;;  %v165_v16 = vpop.f32.mrb[3].mxu0  ;;  %807 = vmatprep.mubr.f32.mxu1 %v167_v11  ;;  %v384_v7 = vld [vmem:[#allocation5 + $0x180] sm:$0xff] }
 0x130   :  { %v1079_v12 = vpack.c.bf16 %v385_v8, %v384_v7  ;;  %v388_v16 = vld [vmem:[#allocation5 + $0x1a0] sm:$0xff]  ;;  %v578_v8 = vld [vmem:[%s1485_s3 + $0x70] sm:$0xff] }
 0x131   :  { %v168_v17 = vmax.f32 %v1384_v15, 0.0  ;;  %v566_v15 = vld [vmem:[%s1485_s3 + $0x10] sm:$0xff] }
 0x132   :  { %v1115_v46 = vpack.c.bf16 %v567_v45, %v566_v15 }
 0x133   :  { %808 = vmatmul.mubr.f32.vlgmr.msra.gmra.mrb[0].mxu1 %v168_v17 }
 0x134   :  { %1018 = vmatpush3.bf16.msra.mxu1 %v1015_v2  ;;  %v381_v2 = vld [vmem:[#allocation5 + $0x170] sm:$0xff] }
 0x135   :  { %1020 = vmatprep.subr.bf16.mxu1 %v1019_v18  ;;  %v1075_v5 = vpack.c.bf16 %v382_v3, %v381_v2  ;;  %v576_v3 = vld [vmem:[%s1485_s3 + $0x60] sm:$0xff] }
 0x137   :  { %1076 = vmatprep.subr.bf16.mxu0 %v1075_v5 }
 0x138   :  { %1022 = vmatpush3.bf16.msra.mxu1 %v1019_v18  ;;  %1078 = vmatpush3.bf16.msra.mxu0 %v1075_v5  ;;  %v389_v18 = vld [vmem:[#allocation5 + $0x1a8] sm:$0xff] }
 0x139   :  { %1024 = vmatprep.subr.bf16.mxu1 %v1023_v21  ;;  %v1087_v19 = vpack.c.bf16 %v389_v18, %v388_v16  ;;  %v577_v5 = vld [vmem:[%s1485_s3 + $0x68] sm:$0xff] }
 0x13a   :  { %v1135_v7 = vpack.c.bf16 %v577_v5, %v576_v3 }
 0x13c   :  { %1026 = vmatpush3.bf16.msra.mxu1 %v1023_v21  ;;  %v391_v21 = vld [vmem:[#allocation5 + $0x1b8] sm:$0xff] }
 0x13d   :  { %1028 = vmatprep.subr.bf16.mxu1 %v1027_v24  ;;  %v1091_v22 = vpack.c.bf16 %v391_v21, %v390_v20 }
 0x140   :  { %1030 = vmatpush3.bf16.msra.mxu1 %v1027_v24  ;;  %v393_v24 = vld [vmem:[#allocation5 + $0x1c8] sm:$0xff] }
 0x141   :  { %1032 = vmatprep.subr.bf16.mxu1 %v1031_v27  ;;  %v1095_v25 = vpack.c.bf16 %v393_v24, %v392_v23 }
 0x144   :  { %1034 = vmatpush3.bf16.msra.mxu1 %v1031_v27  ;;  %v395_v27 = vld [vmem:[#allocation5 + $0x1d8] sm:$0xff] }
 0x145   :  { %1036 = vmatprep.subr.bf16.mxu1 %v1035_v30  ;;  %v1099_v28 = vpack.c.bf16 %v395_v27, %v394_v26 }
 0x148   :  { %1038 = vmatpush3.bf16.msra.mxu1 %v1035_v30  ;;  %v397_v30 = vld [vmem:[#allocation5 + $0x1e8] sm:$0xff] }
 0x149   :  { %1040 = vmatprep.subr.bf16.mxu1 %v1039_v33  ;;  %v1103_v31 = vpack.c.bf16 %v397_v30, %v396_v29 }
 0x14c   :  { %1042 = vmatpush3.bf16.msra.mxu1 %v1039_v33  ;;  %v286_v33 = vrot.slane %v1378_v6, %v285_v32 }
 0x14d   :  { %1044 = vmatprep.subr.bf16.mxu1 %v1043_v36 }
 0x150   :  { %1046 = vmatpush3.bf16.msra.mxu1 %v1043_v36 }
 0x151   :  { %1080 = vmatprep.subr.bf16.mxu1 %v1079_v12 }
 0x206   :  { %v809_v57 = vpop.f32.mrb[0].mxu1 }
 0x207   :  { %v278_v58 = vadd.f32 %v809_v57, %v205_v56  ;;  %v272_v59 = vpop.f32.mrb[1].mxu1  ;;  %v575_v57 = vld [vmem:[%s1485_s3 + $0x58] sm:$0xff] }
 0x208   :  { %v273_v60 = vadd.f32 %v272_v59, %v205_v56  ;;  %v574_v56 = vld [vmem:[%s1485_s3 + $0x50] sm:$0xff]  ;;  %v402_v59 = vsub.s32 3, %v1372_v4 }
 0x209   :  { %v282_v62 = vmax.f32 %v278_v58, 0.0  ;;  %v1131_v58 = vpack.c.bf16 %v575_v57, %v574_v56 }
 0x20a   :  { %v281_v61 = vmax.f32 %v273_v60, 0.0  ;;  %v403_v60 = vrot.slane %v1378_v6, %v402_v59 }
 0x20c   :  { %842 = vmatprep.mubr.f32.mxu1 %v281_v61 }
 0x20d   :  { %843 = vmatmul.mubr.f32.vlgmr.msra.gmra.mrb[2].mxu1 %v282_v62 }
 0x20e   :  { %1082 = vmatpush3.bf16.msra.mxu1 %v1079_v12  ;;  %v1139_v12 = vpack.c.bf16 %v579_v10, %v578_v8 }
 0x20f   :  { %1084 = vmatprep.subr.bf16.mxu1 %v1083_v14 }
 0x212   :  { %1086 = vmatpush3.bf16.msra.mxu1 %v1083_v14  ;;  %v484_v14 = vrot.slane %v1378_v6, %v483_v13 }
 0x213   :  { %1088 = vmatprep.subr.bf16.mxu1 %v1087_v19 }
 0x216   :  { %1090 = vmatpush3.bf16.msra.mxu1 %v1087_v19 }
 0x217   :  { %1092 = vmatprep.subr.bf16.mxu1 %v1091_v22 }
 0x21a   :  { %1094 = vmatpush3.bf16.msra.mxu1 %v1091_v22 }
 0x21b   :  { %1096 = vmatprep.subr.bf16.mxu1 %v1095_v25 }
 0x21e   :  { %1098 = vmatpush3.bf16.msra.mxu1 %v1095_v25  ;;  %v582_v25 = vsub.s32 5, %v1372_v4 }
 0x21f   :  { %1100 = vmatprep.subr.bf16.mxu1 %v1099_v28 }
 0x220   :  { %v583_v26 = vrot.slane %v1378_v6, %v582_v25 }
 0x222   :  { %1102 = vmatpush3.bf16.msra.mxu1 %v1099_v28 }
 0x223   :  { %1104 = vmatprep.subr.bf16.mxu1 %v1103_v31 }
 0x226   :  { %1106 = vmatpush3.bf16.msra.mxu1 %v1103_v31 }
 0x227   :  { %1108 = vmatprep.subr.bf16.mxu1 %v1107_v44 }
 0x22a   :  { %1110 = vmatpush3.bf16.msra.mxu1 %v1107_v44 }
 0x2e0   :  { %v844_v34 = vpop.f32.mrb[2].mxu1 }
 0x2e1   :  { %v359_v35 = vadd.f32 %v844_v34, %v286_v33  ;;  %v353_v36 = vpop.f32.mrb[3].mxu1 }
 0x2e2   :  { %v354_v37 = vadd.f32 %v353_v36, %v286_v33 }
 0x2e3   :  { %v1397_v38 = vadd.f32 %v359_v35, %v168_v17 }
 0x2e4   :  { %v1401_v39 = vadd.f32 %v354_v37, %v167_v11  ;;  %v565_v11 = vld [vmem:[%s1485_s3 + $0x8] sm:$0xff]  ;;  %s1232_s3 = smov [#allocation7]  }
 0x2e5   :  { %v365_v41 = vmax.f32 %v1397_v38, 0.0  ;;  %v1111_v17 = vpack.c.bf16 %v565_v11, %v564_v9  ;;  %s669_s21 = sshll.u32 %s1232_s3, 4  ;;  %s670_s21 = int_to_ptr.vmem [resolvable:$true] %s669_s21 }
 0x2e6   :  { %v364_v40 = vmax.f32 %v1401_v39, 0.0  ;;  %s1196_s22 = scalar_lea.vmem %s670_s21, 256  ;;  %p1201_p3 = scmp.lt.s32.totalorder %s670_s21, %s670_s21 }
 0x2e7   :  { %1112 = vmatprep.subr.bf16.mxu0 %v1111_v17  ;;  %p1197_p2 = scmp.ne.s32.totalorder %s670_s21, %s1196_s22  ;;  %p1202_p4 = scmp.lt.s32.totalorder %s1196_s22, %s1196_s22 }
 0x2e8   :  { %877 = vmatprep.mubr.f32.mxu0 %v364_v40 }
 0x2e9   :  { %878 = vmatmul.mubr.f32.vlgmr.msra.gmra.mrb[4].mxu0 %v365_v41  ;;  %p1203_p5 = por %p1202_p4, %p1201_p3 }
 0x2ea   :  { %1114 = vmatpush3.bf16.msra.mxu0 %v1111_v17 }
 0x2eb   :  { %1116 = vmatprep.subr.bf16.mxu0 %v1115_v46  ;;  %p1204_p6 = pnand %p1203_p5, %p1197_p2 }
 0x2ee   :  { %1118 = vmatpush3.bf16.msra.mxu0 %v1115_v46 }
 0x2ef   :  { %1120 = vmatprep.subr.bf16.mxu0 %v1119_v49 }
 0x2f2   :  { %1122 = vmatpush3.bf16.msra.mxu0 %v1119_v49 }
 0x2f3   :  { %1124 = vmatprep.subr.bf16.mxu0 %v1123_v52 }
 0x2f6   :  { %1126 = vmatpush3.bf16.msra.mxu0 %v1123_v52 }
 0x2f7   :  { %1128 = vmatprep.subr.bf16.mxu0 %v1127_v55 }
 0x2fa   :  { %1130 = vmatpush3.bf16.msra.mxu0 %v1127_v55 }
 0x2fb   :  { %1132 = vmatprep.subr.bf16.mxu0 %v1131_v58 }
 0x2fe   :  { %1134 = vmatpush3.bf16.msra.mxu0 %v1131_v58 }
 0x2ff   :  { %1136 = vmatprep.subr.bf16.mxu0 %v1135_v7 }
 0x302   :  { %1138 = vmatpush3.bf16.msra.mxu0 %v1135_v7 }
 0x303   :  { %1140 = vmatprep.subr.bf16.mxu0 %v1139_v12 }
 0x306   :  { %1142 = vmatpush3.bf16.msra.mxu0 %v1139_v12 }
 0x3bc   :  { %v879_v61 = vpop.f32.mrb[4].mxu0 }
 0x3bd   :  { %v476_v62 = vadd.f32 %v879_v61, %v403_v60  ;;  %v470_v63 = vpop.f32.mrb[5].mxu0 }
 0x3be   :  { %v471_v0 = vadd.f32 %v470_v63, %v403_v60 }
 0x3bf   :  { %v480_v2 = vmax.f32 %v476_v62, 0.0 }
 0x3c0   :  { %v479_v1 = vmax.f32 %v471_v0, 0.0 }
 0x3c2   :  { %912 = vmatprep.mubr.f32.mxu1 %v479_v1 }
 0x3c3   :  { %913 = vmatmul.mubr.f32.vlgmr.msra.gmra.mrb[4].mxu1 %v480_v2 }
 0x496   :  { %v914_v16 = vpop.f32.mrb[4].mxu1 }
 0x497   :  { %v557_v18 = vadd.f32 %v914_v16, %v484_v14  ;;  %v551_v19 = vpop.f32.mrb[5].mxu1 }
 0x498   :  { %v552_v20 = vadd.f32 %v551_v19, %v484_v14 }
 0x499   :  { %v561_v21 = vadd.f32 %v557_v18, %v365_v41 }
 0x49a   :  { %v560_v22 = vadd.f32 %v552_v20, %v364_v40 }
 0x49b   :  { %v563_v24 = vmax.f32 %v561_v21, 0.0 }
 0x49c   :  { %v562_v23 = vmax.f32 %v560_v22, 0.0 }
 0x49e   :  { %947 = vmatprep.mubr.f32.mxu0 %v562_v23 }
 0x49f   :  { %948 = vmatmul.mubr.f32.vlgmr.msra.gmra.mrb[6].mxu0 %v563_v24 }
 0x572   :  { %v949_v27 = vpop.f32.mrb[6].mxu0 }
 0x573   :  { %v656_v28 = vadd.f32 %v949_v27, %v583_v26  ;;  %v650_v29 = vpop.f32.mrb[7].mxu0 }
 0x574   :  { %v651_v30 = vadd.f32 %v650_v29, %v583_v26 }
 0x575   :  { %v660_v31 = vmax.f32 %v656_v28, 0.0 }
 0x576   :  { %v659_v32 = vmax.f32 %v651_v30, 0.0 }
 0x577   :  { %663 = vst.msk [vmem:[#allocation7 + $0x8] sm:$0xff] %vm661_vm2, %v660_v31 }
 0x578   :  { %662 = vst.msk [vmem:[#allocation7] sm:$0xff] %vm661_vm2, %v659_v32 }
 0x579   :  { %1207 = shalt.err (!%p1204_p6)
}
 0x57a   :  { %s1208_s25 = scalar_lea.hbm %s1487_s5, 256 }
 0x57b   :  { %p1209_p7 = scmp.ne.s32.totalorder %s1487_s5, %s1208_s25  ;;  %p1212_p8 = scmp.lt.u32.totalorder %s1208_s25, %s1487_s5 }
 0x57d   :  { %p1214_p9 = pnand %p1212_p8, %p1209_p7 }
 0x57f   :  { %1217 = shalt.err (!%p1214_p9)
}
 0x580   :  { %675 = dma.vmem_to_hbm [thread:$0]  %s670_s21, 256, %s1487_s5, [#allocation4], %s1228_s0, %s1228_s0, %s1229_s17  }
 0x581   :  { %1222 = dma.done.wait [#allocation4], 256  }
 0x582   :  { %1223 = vsyncadd [#allocation4], 4294967040 }
 0x583   :  { %679 = vsyncpa [#allocation3], 1 }
 0x584   :  { %680 = vsyncpa [#allocation6], 1 }
 0x585   :  { %681 = vsyncpa [#allocation4], 1 }

</bundles_post_ra>
